<compile_context>
chip_gen: v5e
topology: v5e:2x2
jax: 0.10.0
libtpu: 0.0.40
codegen_flags: <defaults>
</compile_context>

<pallas_src>
import functools

import jax
import jax.numpy as jnp
from jax.experimental import pallas as pl
from jax.experimental.pallas import tpu as pltpu

_LANE = 128       # lane width (batch tile must be a multiple of this)
_SUBCHUNK = 128   # batch columns per inner step (keeps the intermediate in vregs)


def _round_up(n, m):
    return ((n + m - 1) // m) * m


def mlp2_kernel(xT_ref, w1T_ref, b1_ref, w2_ref, b2_ref, o_ref, *, n_chunks, chunk):
    # Weights / biases are grid-invariant (constant index maps): load once per
    # grid step and keep them in vregs.  They are tiny (Hp=56 rows).
    w1T = w1T_ref[...]           # (Hp, F)  fc1 weights, transposed
    b1 = b1_ref[...]             # (Hp, 1)  fc1 bias column
    w2 = w2_ref[...]             # (Hp, 1)  fc2 weight column
    b2 = b2_ref[0, 0]            # scalar fc2 bias (SMEM)

    # Fully unrolled inner loop over 128-wide batch sub-chunks: the (Hp, chunk)
    # intermediate h stays in registers instead of being staged through VMEM.
    for c in range(n_chunks):
        sl = pl.ds(c * chunk, chunk)                         # static, lane-aligned
        # fc1 on the MXU: (Hp, F) @ (F, chunk), f32 accumulate.
        h = jnp.dot(w1T, xT_ref[:, sl], preferred_element_type=jnp.float32)
        # Bias + ReLU on the VPU (b1 broadcasts across lanes = batch).
        h = jnp.maximum(h + b1, 0.0)
        # fc2 (output width 1): per-lane multiply + sublane-direction reduce
        # (cross-vreg VPU adds + one intra-vreg reduce) -> lane-dense (1, chunk).
        z = jnp.sum(h * w2, axis=0, keepdims=True) + b2
        # Exact sigmoid via tanh: a single EUP op, no approx reciprocal.
        o_ref[:, sl] = 0.5 * jnp.tanh(0.5 * z) + 0.5
    # TODO(synk): batch_norm / dropout branches of forward() are only active for
    # non-default constructor args; not implemented here (defaults are off).


def neural_model_2layer_forward(x, w1, b1, w2, b2, *, block_b=4096,
                                compute_dtype=jnp.float32):
    """sigmoid(relu(x @ w1 + b1) @ w2 + b2) for the default NeuralModel2Layer.

    x: [B, F]; w1: [F, H]; b1: [H] or [1, H]; w2: [H, 1]; b2: [1, 1] -> [B, 1] f32.
    """
    x = jnp.asarray(x, jnp.float32)
    B, F = x.shape
    H = w1.shape[1]
    Hp = _round_up(max(H, 8), 8)   # hidden dim lives on sublanes -> pad to 8 only

    # Batch-in-lanes layout: transpose weights so the batch dim is the lane axis.
    # Zero padding of the hidden dim is inert: relu(0+0)=0, padded w2 rows are 0.
    w1T = jnp.pad(jnp.asarray(w1, jnp.float32).T, ((0, Hp - H), (0, 0)))        # (Hp, F)
    b1c = jnp.pad(jnp.asarray(b1, jnp.float32).reshape(1, H),
                  ((0, 0), (0, Hp - H))).T                                       # (Hp, 1)
    w2c = jnp.pad(jnp.asarray(w2, jnp.float32).reshape(H, 1), ((0, Hp - H), (0, 0)))  # (Hp, 1)
    b2s = jnp.asarray(b2, jnp.float32).reshape(1, 1)

    # Batch tile: multiple of 128; large default amortizes grid-step overhead but
    # keep >= 2 grid steps when possible (v7x megacore shards the parallel axis).
    block_b = max(_LANE, _round_up(block_b, _LANE))
    Bp0 = _round_up(B, _LANE)
    TB = min(block_b, Bp0)
    if Bp0 >= 2 * _LANE:
        TB = min(TB, _round_up((Bp0 + 1) // 2, _LANE))
    Bp = _round_up(B, TB)

    xT = x.T                                     # (F, B): batch -> lanes
    if Bp != B:
        xT = jnp.pad(xT, ((0, 0), (0, Bp - B)))  # padded columns are sliced off below
    # TODO(synk): a production caller would supply x already in (F, B) layout so
    # this transpose fuses away instead of costing an extra HBM pass.

    xT = xT.astype(compute_dtype)
    w1T = w1T.astype(compute_dtype)

    chunk = min(_SUBCHUNK, TB)
    kernel = functools.partial(mlp2_kernel, n_chunks=TB // chunk, chunk=chunk)

    out = pl.pallas_call(
        kernel,
        out_shape=jax.ShapeDtypeStruct((1, Bp), jnp.float32),
        grid=(Bp // TB,),
        in_specs=[
            pl.BlockSpec((F, TB), lambda i: (0, i)),     # x tile (pipelined DMA)
            pl.BlockSpec((Hp, F), lambda i: (0, 0)),     # W1^T, VMEM-resident
            pl.BlockSpec((Hp, 1), lambda i: (0, 0)),     # b1 column, resident
            pl.BlockSpec((Hp, 1), lambda i: (0, 0)),     # W2 column, resident
            pl.BlockSpec((1, 1), lambda i: (0, 0),
                         memory_space=pltpu.MemorySpace.SMEM),  # b2 scalar
        ],
        out_specs=pl.BlockSpec((1, TB), lambda i: (0, i)),       # lane-dense output
        compiler_params=pltpu.CompilerParams(
            dimension_semantics=("parallel",),
        ),
    )(xT, w1T, b1c, w2c, b2s)
    return out.reshape(Bp, 1)[:B]


if __name__ == "__main__":
    # Shapes consistent with the module: input_size=32, intermediate_size=50
    # (the module default), output width 1.
    F, H = 32, 50

    key = jax.random.PRNGKey(0)
    kx, kw1, kb1, kw2, kb2, kx2 = jax.random.split(key, 6)

    # PyTorch-Linear-style init: U(-1/sqrt(fan_in), 1/sqrt(fan_in)).
    bound1 = 1.0 / (F ** 0.5)
    w1 = jax.random.uniform(kw1, (F, H), jnp.float32, -bound1, bound1)
    b1 = jax.random.uniform(kb1, (1, H), jnp.float32, -bound1, bound1)
    bound2 = 1.0 / (H ** 0.5)
    w2 = jax.random.uniform(kw2, (H, 1), jnp.float32, -bound2, bound2)
    b2 = jax.random.uniform(kb2, (1, 1), jnp.float32, -bound2, bound2)

    def ref_fwd(xv):
        return jax.nn.sigmoid(jnp.maximum(xv @ w1 + b1, 0.0) @ w2 + b2)

    # Small batch: single grid step, single inner chunk.
    x_small = jax.random.normal(kx, (8, F), dtype=jnp.float32)
    out_small = jax.block_until_ready(
        neural_model_2layer_forward(x_small, w1, b1, w2, b2))
    assert out_small.shape == (8, 1)
    assert jnp.allclose(out_small, ref_fwd(x_small), atol=1e-3), "small-batch mismatch"

    # Ragged batch: 2 grid steps x 2 inner chunks + batch-tail padding.
    x_big = jax.random.normal(kx2, (300, F), dtype=jnp.float32)
    out_big = jax.block_until_ready(
        neural_model_2layer_forward(x_big, w1, b1, w2, b2, block_b=512))
    assert out_big.shape == (300, 1)
    assert jnp.allclose(out_big, ref_fwd(x_big), atol=1e-3), "tiled-batch mismatch"

    # Optional bf16 activation/weight path (HBM-bound win on v6e/v7x); f32 accum.
    out_bf16 = jax.block_until_ready(
        neural_model_2layer_forward(x_big, w1, b1, w2, b2, block_b=512,
                                    compute_dtype=jnp.bfloat16))
    assert out_bf16.shape == (300, 1)
    assert jnp.allclose(out_bf16, ref_fwd(x_big), atol=2e-2), "bf16-path mismatch"

    print("KERNEL_OK")
</pallas_src>

<mosaic_0001>
module attributes {stable_mosaic.version = 11 : i64} {
  func.func @mlp2_kernel(%arg0: i32, %arg1: memref<32x128xf32, #tpu.memory_space<vmem>>, %arg2: memref<56x32xf32, #tpu.memory_space<vmem>>, %arg3: memref<56x1xf32, #tpu.memory_space<vmem>>, %arg4: memref<56x1xf32, #tpu.memory_space<vmem>>, %arg5: memref<1x1xf32, #tpu.memory_space<smem>>, %arg6: memref<1x128xf32, #tpu.memory_space<vmem>>) attributes {dimension_semantics = [#tpu.dimension_semantics<parallel>], iteration_bounds = array<i64: 1>, scalar_prefetch = 0 : i64, scratch_operands = 0 : i64, tpu.core_type = #tpu.core_type<tc>, window_params = [{transform_indices = @transform_0, window_bounds = array<i64: 32, 128>}, {pipeline_mode = #tpu.pipeline_mode<synchronous>, transform_indices = @transform_1, window_bounds = array<i64: 56, 32>}, {pipeline_mode = #tpu.pipeline_mode<synchronous>, transform_indices = @transform_2, window_bounds = array<i64: 56, 1>}, {pipeline_mode = #tpu.pipeline_mode<synchronous>, transform_indices = @transform_3, window_bounds = array<i64: 56, 1>}, {transform_indices = @transform_4, window_bounds = array<i64: 1, 1>}, {transform_indices = @transform_5, window_bounds = array<i64: 1, 128>}]} {
    %c0 = arith.constant 0 : index
    %c0_0 = arith.constant 0 : index
    %0 = vector.load %arg2[%c0, %c0_0] : memref<56x32xf32, #tpu.memory_space<vmem>>, vector<56x32xf32>
    %c0_1 = arith.constant 0 : index
    %c0_2 = arith.constant 0 : index
    %1 = vector.load %arg3[%c0_1, %c0_2] : memref<56x1xf32, #tpu.memory_space<vmem>>, vector<56x1xf32>
    %c0_3 = arith.constant 0 : index
    %c0_4 = arith.constant 0 : index
    %2 = vector.load %arg4[%c0_3, %c0_4] : memref<56x1xf32, #tpu.memory_space<vmem>>, vector<56x1xf32>
    %c0_5 = arith.constant 0 : index
    %c0_6 = arith.constant 0 : index
    %3 = memref.load %arg5[%c0_5, %c0_6] : memref<1x1xf32, #tpu.memory_space<smem>>
    %c0_7 = arith.constant 0 : index
    %c0_8 = arith.constant 0 : index
    %4 = vector.load %arg1[%c0_7, %c0_8] : memref<32x128xf32, #tpu.memory_space<vmem>>, vector<32x128xf32>
    %cst = arith.constant dense<0.000000e+00> : vector<56x128xf32>
    %5 = tpu.matmul %0, %4, %cst {dimension_numbers = #tpu.dot_dimension_numbers<[1], [0], [0], [1], [0, 0, 1, 1], [], []>} : vector<56x32xf32>, vector<32x128xf32>, vector<56x128xf32> -> vector<56x128xf32>
    %6 = vector.broadcast %1 : vector<56x1xf32> to vector<56x128xf32>
    %7 = arith.addf %5, %6 : vector<56x128xf32>
    %cst_9 = arith.constant 0.000000e+00 : f32
    %8 = vector.broadcast %cst_9 : f32 to vector<56x128xf32>
    %9 = arith.maximumf %7, %8 : vector<56x128xf32>
    %10 = vector.broadcast %2 : vector<56x1xf32> to vector<56x128xf32>
    %11 = arith.mulf %9, %10 : vector<56x128xf32>
    %cst_10 = arith.constant dense<0.000000e+00> : vector<128xf32>
    %12 = vector.multi_reduction <add>, %11, %cst_10 [0] : vector<56x128xf32> to vector<128xf32>
    %13 = vector.shape_cast %12 : vector<128xf32> to vector<1x128xf32>
    %14 = vector.broadcast %3 : f32 to vector<1x128xf32>
    %15 = arith.addf %13, %14 : vector<1x128xf32>
    %cst_11 = arith.constant 5.000000e-01 : f32
    %16 = vector.broadcast %cst_11 : f32 to vector<1x128xf32>
    %17 = arith.mulf %16, %15 : vector<1x128xf32>
    %18 = math.tanh %17 : vector<1x128xf32>
    %cst_12 = arith.constant 5.000000e-01 : f32
    %19 = vector.broadcast %cst_12 : f32 to vector<1x128xf32>
    %20 = arith.mulf %19, %18 : vector<1x128xf32>
    %cst_13 = arith.constant 5.000000e-01 : f32
    %21 = vector.broadcast %cst_13 : f32 to vector<1x128xf32>
    %22 = arith.addf %20, %21 : vector<1x128xf32>
    %c0_14 = arith.constant 0 : index
    %c0_15 = arith.constant 0 : index
    %23 = vector.load %arg6[%c0_14, %c0_15] : memref<1x128xf32, #tpu.memory_space<vmem>>, vector<1x128xf32>
    tpu.vector_store %arg6[%c0_14, %c0_15], %22 {strides = array<i32>} : memref<1x128xf32, #tpu.memory_space<vmem>>, vector<1x128xf32>,
    return
  }
  func.func @transform_0(%arg0: i32) -> (i32, i32) {
    %c0_i32 = arith.constant 0 : i32
    %c0_i32_0 = arith.constant 0 : i32
    return %c0_i32, %arg0 : i32, i32
  }
  func.func @transform_1(%arg0: i32) -> (i32, i32) {
    %c0_i32 = arith.constant 0 : i32
    %c0_i32_0 = arith.constant 0 : i32
    %c0_i32_1 = arith.constant 0 : i32
    return %c0_i32, %c0_i32_0 : i32, i32
  }
  func.func @transform_2(%arg0: i32) -> (i32, i32) {
    %c0_i32 = arith.constant 0 : i32
    %c0_i32_0 = arith.constant 0 : i32
    %c0_i32_1 = arith.constant 0 : i32
    return %c0_i32, %c0_i32_0 : i32, i32
  }
  func.func @transform_3(%arg0: i32) -> (i32, i32) {
    %c0_i32 = arith.constant 0 : i32
    %c0_i32_0 = arith.constant 0 : i32
    %c0_i32_1 = arith.constant 0 : i32
    return %c0_i32, %c0_i32_0 : i32, i32
  }
  func.func @transform_4(%arg0: i32) -> (i32, i32) {
    %c0_i32 = arith.constant 0 : i32
    %c0_i32_0 = arith.constant 0 : i32
    %c0_i32_1 = arith.constant 0 : i32
    return %c0_i32, %c0_i32_0 : i32, i32
  }
  func.func @transform_5(%arg0: i32) -> (i32, i32) {
    %c0_i32 = arith.constant 0 : i32
    %c0_i32_0 = arith.constant 0 : i32
    return %c0_i32, %arg0 : i32, i32
  }
}

</mosaic_0001>

<bundles_post_ra>
// kernel: tpu_custom_call.1
= control target key start
LH: loop header
LB: loop body
LE: loop exit
PB: predicated region body
PF: predicated region fallthrough
CT: control target
= control target key end

     0   :  { %v279_v1 = vmov 0   ;;  %vm83_vm0 = vcmask 261120   ;;  %s399_s0 = inlined_call_operand.vmem [shape: f32[32,128], index: 0, kind: input, shape index: {}]   ;;  %s400_s1 = inlined_call_operand.vmem [shape: f32[56,32], index: 1, kind: input, shape index: {}]   ;;  %s401_s2 = inlined_call_operand.vmem [shape: f32[56,1], index: 2, kind: input, shape index: {}]   ;;  %s402_s3 = inlined_call_operand.vmem [shape: f32[56,1], index: 3, kind: input, shape index: {}]   ;;  %s403_s4 = inlined_call_operand.<no memory space> [shape: f32[1,1], index: 4, kind: input, shape index: {}]   ;;  %s404_s5 = inlined_call_operand.hbm [shape: f32[1,128], index: 5, kind: output, shape index: {}]  }
   0x1   :  { %v47_v0 = vld [vmem:[%s399_s0 + $0x18] sm:$0xff]  ;;  %249 = vset.pattern.permute.xlu1 %v279_v1  ;;  %248 = vset.pattern.permute.xlu0 %v279_v1  ;;  %v31_v2 = vld [vmem:[%s401_s2 + $0x10] sm:$0xff]  ;;  %v29_v3 = vld [vmem:[%s401_s2] sm:$0xff] }
   0x2   :  { %117 = vmatpush.msra.mxu0 %v47_v0  ;;  %234 = vmatpush.msra.mxu1 %v47_v0  ;;  %v46_v4 = vld [vmem:[%s399_s0 + $0x10] sm:$0xff]  ;;  %v45_v5 = vld [vmem:[%s399_s0 + $0x8] sm:$0xff]  ;;  %v44_v6 = vld [vmem:[%s399_s0] sm:$0xff] }
   0x3   :  { %235 = vmatpush.msra.mxu2 %v47_v0  ;;  %236 = vmatpush.msra.mxu3 %v47_v0  ;;  %v22_v7 = vld [vmem:[%s400_s1] sm:$0xff]  ;;  %v24_v8 = vld [vmem:[%s400_s1 + $0x10] sm:$0xff] }
   0x4   :  { %60 = vperm.xlu1 %249, %v31_v2   ;;  %50 = vperm.xlu0 %248, %v29_v3  }
   0x5   :  { %118 = vmatpush.msra.mxu0 %v46_v4  ;;  %237 = vmatpush.msra.mxu1 %v46_v4 }
   0x6   :  { %238 = vmatpush.msra.mxu2 %v46_v4  ;;  %239 = vmatpush.msra.mxu3 %v46_v4 }
   0x7   :  { %119 = vmatpush.msra.mxu0 %v45_v5  ;;  %240 = vmatpush.msra.mxu1 %v45_v5 }
   0x8   :  { %241 = vmatpush.msra.mxu2 %v45_v5  ;;  %242 = vmatpush.msra.mxu3 %v45_v5 }
   0x9   :  { %11 = vsyncpa [#allocation4], 0  ;;  %120 = vmatpush.msra.mxu0 %v44_v6  ;;  %243 = vmatpush.msra.mxu1 %v44_v6  ;;  %v26_v9 = vld [vmem:[%s400_s1 + $0x20] sm:$0xff]  ;;  %v27_v10 = vld [vmem:[%s400_s1 + $0x28] sm:$0xff]  ;;  %s280_s15 = smov [#allocation3]   ;;  %s218_s19 = sshll.u32 %s404_s5, 4  ;;  %s219_s19 = int_to_ptr.hbm [resolvable:$true] %s218_s19 }
   0xa   :  { %244 = vmatpush.msra.mxu2 %v44_v6  ;;  %245 = vmatpush.msra.mxu3 %v44_v6  ;;  %v32_v11 = vld [vmem:[%s401_s2 + $0x18] sm:$0xff]  ;;  %v30_v12 = vld [vmem:[%s401_s2 + $0x8] sm:$0xff]  ;;  %v36_v13 = vld [vmem:[%s402_s3] sm:$0xff]  ;;  %s216_s16 = sshll.u32 %s280_s15, 4  ;;  %s217_s16 = int_to_ptr.vmem [resolvable:$true] %s216_s16 }
   0xb   :  { %227 = vmatmul.msk.f32.vlgmr.msra.gmra.mxu0 %vm83_vm0, %v22_v7  ;;  %229 = vmatmul.msk.f32.vlgmr.msra.gmra.mxu1 %vm83_vm0, %v24_v8  ;;  %v23_v14 = vld [vmem:[%s400_s1 + $0x8] sm:$0xff]  ;;  %v25_v15 = vld [vmem:[%s400_s1 + $0x18] sm:$0xff]  ;;  %v28_v16 = vld [vmem:[%s400_s1 + $0x30] sm:$0xff] }
   0xc   :  { %231 = vmatmul.msk.f32.vlgmr.msra.gmra.mxu2 %vm83_vm0, %v26_v9  ;;  %232 = vmatmul.msk.f32.vlgmr.msra.gmra.mxu3 %vm83_vm0, %v27_v10  ;;  %v38_v17 = vld [vmem:[%s402_s3 + $0x10] sm:$0xff]  ;;  %v33_v18 = vld [vmem:[%s401_s2 + $0x20] sm:$0xff]  ;;  %v37_v19 = vld [vmem:[%s402_s3 + $0x8] sm:$0xff] }
   0xd   :  { %65 = vperm.xlu1 %249, %v32_v11   ;;  %55 = vperm.xlu0 %248, %v30_v12   ;;  %v35_v20 = vld [vmem:[%s401_s2 + $0x30] sm:$0xff]  ;;  %v39_v21 = vld [vmem:[%s402_s3 + $0x18] sm:$0xff]  ;;  %v34_v22 = vld [vmem:[%s401_s2 + $0x28] sm:$0xff] }
   0xe   :  { %250 = vset.pattern.permute.xlu2 %v279_v1  ;;  %v42_v23 = vld [vmem:[%s402_s3 + $0x30] sm:$0xff]  ;;  %v41_v24 = vld [vmem:[%s402_s3 + $0x28] sm:$0xff]  ;;  %v40_v25 = vld [vmem:[%s402_s3 + $0x20] sm:$0xff] }
   0xf   :  { %152 = vperm.xlu2 %250, %v36_v13  }
  0x13   :  { %228 = vmatmul.msk.f32.gmra.mxu0 %vm83_vm0, %v23_v14  ;;  %230 = vmatmul.msk.f32.gmra.mxu1 %vm83_vm0, %v25_v15  ;;  %v204_v15 = vstv %s403_s4 }
  0x14   :  { %233 = vmatmul.msk.f32.gmra.mxu3 %vm83_vm0, %v28_v16 }
  0x15   :  { %162 = vperm.xlu1 %249, %v38_v17   ;;  %70 = vperm.xlu0 %248, %v33_v18  }
  0x17   :  { %157 = vperm.xlu2 %250, %v37_v19  }
  0x1d   :  { %80 = vperm.xlu1 %249, %v35_v20   ;;  %167 = vperm.xlu0 %248, %v39_v21  }
  0x1f   :  { %75 = vperm.xlu2 %250, %v34_v22  }
  0x25   :  { %182 = vperm.xlu1 %249, %v42_v23   ;;  %177 = vperm.xlu0 %248, %v41_v24  }
  0x27   :  { %172 = vperm.xlu2 %250, %v40_v25  }
  0x69   :  { %v153_v28 = vpop.permute.xlu2 %152 }
  0x71   :  { %v158_v31 = vpop.permute.xlu2 %157 }
  0x76   :  { %v51_v26 = vpop.permute.xlu0 %50  ;;  %v61_v27 = vpop.permute.xlu1 %60 }
  0x79   :  { %v76_v37 = vpop.permute.xlu2 %75 }
  0x7f   :  { %v56_v29 = vpop.permute.xlu0 %55  ;;  %v66_v30 = vpop.permute.xlu1 %65 }
  0x81   :  { %v173_v62 = vpop.permute.xlu2 %172 }
  0x87   :  { %v71_v32 = vpop.permute.xlu0 %70  ;;  %v163_v35 = vpop.permute.xlu1 %162 }
  0x88   :  { %v122_v33 = vpop.f32.mrf.mxu0  ;;  %v128_v34 = vpop.f32.mrf.mxu1 }
  0x89   :  { %v123_v36 = vadd.f32 %v122_v33, %v51_v26  ;;  %v129_v38 = vadd.f32 %v128_v34, %v61_v27 }
  0x8b   :  { %v143_v44 = vmax.f32 %v123_v36, 0.0  ;;  %v145_v47 = vmax.f32 %v129_v38, 0.0 }
  0x8d   :  { %v185_v51 = vmul.f32 %v153_v28, %v143_v44  ;;  %v187_v54 = vmul.f32 %v163_v35, %v145_v47 }
  0x8f   :  { %v137_v39 = vpop.f32.mrf.mxu3  ;;  %v134_v40 = vpop.f32.mrf.mxu2 }
  0x90   :  { %v168_v41 = vpop.permute.xlu0 %167  ;;  %v125_v42 = vpop.f32.mrf.mxu0  ;;  %v135_v48 = vadd.f32 %v134_v40, %v71_v32  ;;  %v138_v57 = vadd.f32 %v137_v39, %v76_v37 }
  0x91   :  { %v131_v43 = vpop.f32.mrf.mxu1  ;;  %v126_v45 = vadd.f32 %v125_v42, %v56_v29  ;;  %v81_v50 = vpop.permute.xlu1 %80 }
  0x92   :  { %v132_v46 = vadd.f32 %v131_v43, %v66_v30  ;;  %v147_v56 = vmax.f32 %v135_v48, 0.0  ;;  %v148_v1 = vmax.f32 %v138_v57, 0.0 }
  0x93   :  { %v144_v49 = vmax.f32 %v126_v45, 0.0 }
  0x94   :  { %v146_v53 = vmax.f32 %v132_v46, 0.0  ;;  %v189_v0 = vmul.f32 %v173_v62, %v147_v56 }
  0x95   :  { %v186_v52 = vmul.f32 %v158_v31, %v144_v49 }
  0x96   :  { %v188_v60 = vmul.f32 %v168_v41, %v146_v53 }
  0x97   :  { %v140_v55 = vpop.f32.mrf.mxu3  ;;  %v192_v58 = vadd.f32 %v186_v52, %v185_v51 }
  0x98   :  { %v141_v59 = vadd.f32 %v140_v55, %v81_v50  ;;  %v178_v63 = vpop.permute.xlu0 %177 }
  0x99   :  { %v193_v61 = vadd.f32 %v192_v58, %v187_v54  ;;  %v190_v4 = vmul.f32 %v178_v63, %v148_v1  ;;  %v183_v6 = vpop.permute.xlu1 %182 }
  0x9a   :  { %v149_v3 = vmax.f32 %v141_v59, 0.0 }
  0x9b   :  { %v194_v2 = vadd.f32 %v193_v61, %v188_v60 }
  0x9c   :  { %v191_v7 = vmul.f32 %v183_v6, %v149_v3 }
  0x9d   :  { %v195_v5 = vadd.f32 %v194_v2, %v189_v0 }
  0x9f   :  { %v196_v8 = vadd.f32 %v195_v5, %v190_v4 }
  0xa1   :  { %v197_v9 = vadd.f32 %v196_v8, %v191_v7 }
  0xa3   :  { %v198_v10 = vrot.slane %v197_v9, 4 }
  0xa5   :  { %v199_v11 = vadd.f32 %v198_v10, %v197_v9 }
  0xa7   :  { %v200_v12 = vrot.slane %v199_v11, 2 }
  0xa9   :  { %v201_v13 = vadd.f32 %v200_v12, %v199_v11 }
  0xab   :  { %v202_v14 = vrot.slane %v201_v13, 1 }
  0xad   :  { %v203_v16 = vadd.f32 %v202_v14, %v201_v13 }
  0xaf   :  { %v205_v17 = vadd.f32 %v204_v15, %v203_v16 }
  0xb1   :  { %v206_v18 = vmul.f32 0.5, %v205_v17 }
  0xb3   :  { %251 = vtanh.f32 %v206_v18 }
  0xb9   :  { %v252_v19 = vpop.eup %251 }
  0xba   :  { %v208_v20 = vmul.f32 0.5, %v252_v19 }
  0xbc   :  { %v209_v21 = vadd.f32 0.5, %v208_v20 }
  0xbe   :  { %210 = vst [vmem:[#allocation3] sm:$0x1] %v209_v21 }
  0xbf   :  { %221 = dma.vmem_to_hbm [thread:$0]  %s217_s16, 16, %s219_s19, [#allocation4]  }
  0xc0   :  { %277 = dma.done.wait [#allocation4], 16  }
  0xc1   :  { %278 = vsyncadd [#allocation4], 4294967280 }
  0xc2   :  { %226 = vsyncpa [#allocation4], 1 }

</bundles_post_ra>
